<compile_context>
chip_gen: v7x
topology: tpu7x:2x2x1
jax: 0.10.0
libtpu: 0.0.40
codegen_flags: <defaults>
</compile_context>

<pallas_src>
import jax
import jax.numpy as jnp
from jax.experimental import pallas as pl
from jax.experimental.pallas import tpu as pltpu

# ---- configuration (small, consistent with the module) ----------------------
BS = 2
NUM_NODES = 64            # genes / graph nodes
N_FEATURES = 16
N_CLASSES = 8
NUM_LAYERS = 3            # mlp1 + (NUM_LAYERS-1) hidden mlps
HIDDEN = 32
HIDDEN_FC = 32
N_CMT = 16                # number of pathway communities (lin1 input size)
N_EDGES = 256             # pathway (row, col) pairs

assert HIDDEN_FC == HIDDEN and N_FEATURES <= HIDDEN and N_CLASSES <= HIDDEN
assert NUM_NODES % 8 == 0

# ---- packed-parameter layout (rows of a (P_ROWS, HIDDEN) f32 buffer) --------
def _align8(n):
    return ((n + 7) // 8) * 8

R_W1 = 0                                             # w1      (F, H)
R_WH = _align8(R_W1 + N_FEATURES)                    # wh[l]   (H, H) at +l*H
R_WFC = _align8(R_WH + (NUM_LAYERS - 1) * HIDDEN)    # wfc[l]  (1, H) at +8*l
R_B1 = _align8(R_WFC + 8 * NUM_LAYERS)               # b1      (1, H)
R_BH = _align8(R_B1 + 1)                             # bh[l]   (1, H) at +8*l
R_WL1 = _align8(R_BH + 8 * (NUM_LAYERS - 1))         # wlin1   (N_CMT, HF)
R_BL1 = _align8(R_WL1 + N_CMT)                       # blin1   (1, HF)
R_WL2T = _align8(R_BL1 + 1)                          # wlin2^T (C, HF)
R_BL2 = _align8(R_WL2T + N_CLASSES)                  # blin2   (1, C) padded
R_BFC = _align8(R_BL2 + 1)                           # bfc broadcast row
P_ROWS = _align8(R_BFC + 1)


# ---- the fused kernel --------------------------------------------------------
def fused_kernel(x_ref, mt_ref, p_ref, out_ref):
    # x_ref : (BS*NUM_NODES, N_FEATURES)   node features, batches flattened
    # mt_ref: (NUM_NODES, N_CMT)           mean-aggregation matrix, transposed
    # p_ref : (P_ROWS, HIDDEN)             packed parameters
    # out   : (BS, N_CLASSES)              log-probabilities
    x = x_ref[...]

    # ---- node-wise MLP, fc-over-interleaved-cat as running accumulator ----
    w1 = p_ref[R_W1:R_W1 + N_FEATURES, :]
    b1 = p_ref[R_B1:R_B1 + 1, :]
    h = jnp.maximum(jnp.dot(x, w1, preferred_element_type=jnp.float32) + b1, 0.0)
    acc = h * p_ref[R_WFC:R_WFC + 1, :]              # layer-0 fc weights row
    for l in range(NUM_LAYERS - 1):
        wl = p_ref[R_WH + l * HIDDEN:R_WH + (l + 1) * HIDDEN, :]
        bl = p_ref[R_BH + 8 * l:R_BH + 8 * l + 1, :]
        h = jnp.maximum(jnp.dot(h, wl, preferred_element_type=jnp.float32) + bl, 0.0)
        acc = acc + h * p_ref[R_WFC + 8 * (l + 1):R_WFC + 8 * (l + 1) + 1, :]

    # ---- pathway aggregation:  cmt[b,c] = sum_n M[c,n] * sum_h acc[b,n,h] --
    mt = mt_ref[...]                                  # (NUM_NODES, N_CMT)
    ones_row = jnp.ones((1, HIDDEN), jnp.float32)
    trans_b = (((1,), (1,)), ((), ()))                # contract last dims
    cmt_rows = []
    for b in range(BS):                               # static, BS == 2
        acc_b = acc[b * NUM_NODES:(b + 1) * NUM_NODES, :]          # (NN, H)
        ns_row = jax.lax.dot_general(ones_row, acc_b, trans_b,
                                     preferred_element_type=jnp.float32)  # (1, NN)
        cmt_rows.append(jnp.dot(ns_row, mt,
                                preferred_element_type=jnp.float32))      # (1, N_CMT)
    bfc = p_ref[R_BFC:R_BFC + 1, :][:, :1]            # (1, 1)
    cmt = jnp.concatenate(cmt_rows, axis=0) + bfc     # (BS, N_CMT)

    # ---- head: lin1 -> relu -> lin2 -> log_softmax (dropout = identity) ----
    wlin1 = p_ref[R_WL1:R_WL1 + N_CMT, :]
    blin1 = p_ref[R_BL1:R_BL1 + 1, :]
    h2 = jnp.maximum(
        jnp.dot(cmt, wlin1, preferred_element_type=jnp.float32) + blin1, 0.0)
    w2t = p_ref[R_WL2T:R_WL2T + N_CLASSES, :]         # lin2 weight, transposed
    blin2 = p_ref[R_BL2:R_BL2 + 1, :][:, :N_CLASSES]
    logits = jax.lax.dot_general(h2, w2t, trans_b,
                                 preferred_element_type=jnp.float32) + blin2
    m = jnp.max(logits, axis=-1, keepdims=True)
    lse = jnp.log(jnp.sum(jnp.exp(logits - m), axis=-1, keepdims=True)) + m
    out_ref[...] = logits - lse


def fused_forward(x2d, mt, packed):
    return pl.pallas_call(
        fused_kernel,
        out_shape=jax.ShapeDtypeStruct((BS, N_CLASSES), jnp.float32),
        grid=(1,),
        in_specs=[
            pl.BlockSpec(x2d.shape, lambda i: (0, 0)),
            pl.BlockSpec(mt.shape, lambda i: (0, 0)),
            pl.BlockSpec(packed.shape, lambda i: (0, 0)),
        ],
        out_specs=pl.BlockSpec((BS, N_CLASSES), lambda i: (0, 0)),
    )(x2d, mt, packed)


@jax.jit
def mlp_model_forward(x, mt, packed):
    bs, nn, nf = x.shape
    x2d = x.reshape(bs * nn, nf)                      # trivial host-side reshape
    return fused_forward(x2d, mt, packed)


# ---- parameters (deterministic, torch-Linear-style uniform init) ------------
def _uniform(key, shape, fan_in):
    bound = 1.0 / jnp.sqrt(float(fan_in))
    return jax.random.uniform(key, shape, jnp.float32, -bound, bound)


def init_params(key):
    ks = jax.random.split(key, 10)
    p = {}
    p["w1"] = _uniform(ks[0], (N_FEATURES, HIDDEN), N_FEATURES)
    p["b1"] = _uniform(ks[1], (1, HIDDEN), N_FEATURES)
    p["wh"] = _uniform(ks[2], (NUM_LAYERS - 1, HIDDEN, HIDDEN), HIDDEN)
    p["bh"] = _uniform(ks[3], (NUM_LAYERS - 1, 1, HIDDEN), HIDDEN)
    # torch fc: Linear(NUM_LAYERS*HIDDEN, 1); input order is [h0_l0, h0_l1, ...]
    # because of stack(xs, -1).view(...), i.e. index = h*NUM_LAYERS + l.
    p["wfc_full"] = _uniform(ks[4], (NUM_LAYERS * HIDDEN,), NUM_LAYERS * HIDDEN)
    p["bfc"] = _uniform(ks[5], (1, 1), NUM_LAYERS * HIDDEN)
    p["wlin1"] = _uniform(ks[6], (N_CMT, HIDDEN_FC), N_CMT)
    p["blin1"] = _uniform(ks[7], (1, HIDDEN_FC), N_CMT)
    p["wlin2"] = _uniform(ks[8], (HIDDEN_FC, N_CLASSES), HIDDEN_FC)
    p["blin2"] = _uniform(ks[9], (1, N_CLASSES), HIDDEN_FC)
    return p


def pack_params(p):
    """Pack all parameters into one (P_ROWS, HIDDEN) buffer (done once)."""
    wfc_deint = p["wfc_full"].reshape(HIDDEN, NUM_LAYERS).T     # [l, h]
    P = jnp.zeros((P_ROWS, HIDDEN), jnp.float32)
    P = P.at[R_W1:R_W1 + N_FEATURES, :].set(p["w1"])
    for l in range(NUM_LAYERS - 1):
        P = P.at[R_WH + l * HIDDEN:R_WH + (l + 1) * HIDDEN, :].set(p["wh"][l])
        P = P.at[R_BH + 8 * l, :].set(p["bh"][l, 0])
    for l in range(NUM_LAYERS):
        P = P.at[R_WFC + 8 * l, :].set(wfc_deint[l])
    P = P.at[R_B1, :].set(p["b1"][0])
    P = P.at[R_WL1:R_WL1 + N_CMT, :].set(p["wlin1"])
    P = P.at[R_BL1, :].set(p["blin1"][0])
    P = P.at[R_WL2T:R_WL2T + N_CLASSES, :].set(p["wlin2"].T)
    P = P.at[R_BL2, :N_CLASSES].set(p["blin2"][0])
    P = P.at[R_BFC, :].set(p["bfc"][0, 0])
    return P


def build_agg_matrix_t(row, col):
    """scatter_mean(x[row], col) as a dense matrix, transposed: (NN, N_CMT)."""
    a = jnp.zeros((N_CMT, NUM_NODES), jnp.float32).at[col, row].add(1.0)
    cnt = jnp.sum(a, axis=1, keepdims=True)
    m = a / jnp.maximum(cnt, 1.0)                    # mean weights (0 if empty)
    return m.T


# ---- pure-JAX reference (mirrors the torch code path exactly) ----------------
def reference_forward(x, params, row, col):
    bs, nn, _ = x.shape
    h = jax.nn.relu(x @ params["w1"] + params["b1"])
    xs = [h]
    for l in range(NUM_LAYERS - 1):
        h = jax.nn.relu(h @ params["wh"][l] + params["bh"][l])
        xs.append(h)
    cat = jnp.stack(xs, -1).reshape(bs, nn, -1)       # torch.stack(xs,-1).view(...)
    d = cat.shape[-1]
    t = jnp.transpose(cat, (1, 0, 2))                 # (nn, bs, D)
    gathered = t[row]                                 # x[self.row]
    sums = jnp.zeros((N_CMT, bs, d), jnp.float32).at[col].add(gathered)
    cnt = jnp.zeros((N_CMT,), jnp.float32).at[col].add(1.0)
    mean = sums / jnp.maximum(cnt, 1.0)[:, None, None]          # scatter_mean
    agg = jnp.transpose(mean, (1, 0, 2)).reshape(-1, d)         # (bs*n_cmt, D)
    s = (agg @ params["wfc_full"][:, None] + params["bfc"]).reshape(bs, N_CMT)
    h2 = jax.nn.relu(s @ params["wlin1"] + params["blin1"])
    logits = h2 @ params["wlin2"] + params["blin2"]
    return jax.nn.log_softmax(logits, axis=-1)


if __name__ == "__main__":
    key = jax.random.PRNGKey(0)
    kp, kx, kr, kc = jax.random.split(key, 4)

    params = init_params(kp)
    packed = pack_params(params)                      # precomputed once

    x = jax.random.normal(kx, (BS, NUM_NODES, N_FEATURES), jnp.float32)

    # deterministic pathway: row = node index, col = community index
    row = jax.random.randint(kr, (N_EDGES,), 0, NUM_NODES, dtype=jnp.int32)
    col = jnp.concatenate([
        jnp.arange(N_CMT, dtype=jnp.int32),           # every community non-empty
        jax.random.randint(kc, (N_EDGES - N_CMT,), 0, N_CMT, dtype=jnp.int32),
    ])
    mt = build_agg_matrix_t(row, col)                 # precomputed once

    out = mlp_model_forward(x, mt, packed)
    out = jax.block_until_ready(out)
    assert out.shape == (BS, N_CLASSES), out.shape

    ref = reference_forward(x, params, row, col)
    err = float(jnp.max(jnp.abs(out - ref)))
    assert jnp.allclose(out, ref, atol=1e-4, rtol=1e-4), err

    print("KERNEL_OK")
</pallas_src>

<mosaic_0001>
module attributes {stable_mosaic.version = 11 : i64} {
  func.func @fused_kernel(%arg0: i32, %arg1: memref<128x16xf32, #tpu.memory_space<vmem>>, %arg2: memref<64x16xf32, #tpu.memory_space<vmem>>, %arg3: memref<176x32xf32, #tpu.memory_space<vmem>>, %arg4: memref<2x8xf32, #tpu.memory_space<vmem>>) attributes {dimension_semantics = [#tpu.dimension_semantics<arbitrary>], iteration_bounds = array<i64: 1>, scalar_prefetch = 0 : i64, scratch_operands = 0 : i64, tpu.core_type = #tpu.core_type<tc>, window_params = [{pipeline_mode = #tpu.pipeline_mode<synchronous>, transform_indices = @transform_0, window_bounds = array<i64: 128, 16>}, {pipeline_mode = #tpu.pipeline_mode<synchronous>, transform_indices = @transform_1, window_bounds = array<i64: 64, 16>}, {pipeline_mode = #tpu.pipeline_mode<synchronous>, transform_indices = @transform_2, window_bounds = array<i64: 176, 32>}, {pipeline_mode = #tpu.pipeline_mode<synchronous>, transform_indices = @transform_3, window_bounds = array<i64: 2, 8>}]} {
    %c0 = arith.constant 0 : index
    %c0_0 = arith.constant 0 : index
    %0 = vector.load %arg1[%c0, %c0_0] : memref<128x16xf32, #tpu.memory_space<vmem>>, vector<128x16xf32>
    %c0_1 = arith.constant 0 : index
    %c0_2 = arith.constant 0 : index
    %1 = vector.load %arg3[%c0_1, %c0_2] : memref<176x32xf32, #tpu.memory_space<vmem>>, vector<16x32xf32>
    %c104 = arith.constant 104 : index
    %c0_3 = arith.constant 0 : index
    %2 = vector.load %arg3[%c104, %c0_3] : memref<176x32xf32, #tpu.memory_space<vmem>>, vector<1x32xf32>
    %cst = arith.constant dense<0.000000e+00> : vector<128x32xf32>
    %3 = tpu.matmul %0, %1, %cst {dimension_numbers = #tpu.dot_dimension_numbers<[1], [0], [0], [1], [0, 0, 1, 1], [], []>} : vector<128x16xf32>, vector<16x32xf32>, vector<128x32xf32> -> vector<128x32xf32>
    %4 = vector.broadcast %2 : vector<1x32xf32> to vector<128x32xf32>
    %5 = arith.addf %3, %4 : vector<128x32xf32>
    %cst_4 = arith.constant 0.000000e+00 : f32
    %6 = vector.broadcast %cst_4 : f32 to vector<128x32xf32>
    %7 = arith.maximumf %5, %6 : vector<128x32xf32>
    %c80 = arith.constant 80 : index
    %c0_5 = arith.constant 0 : index
    %8 = vector.load %arg3[%c80, %c0_5] : memref<176x32xf32, #tpu.memory_space<vmem>>, vector<1x32xf32>
    %9 = vector.broadcast %8 : vector<1x32xf32> to vector<128x32xf32>
    %10 = arith.mulf %7, %9 : vector<128x32xf32>
    %c16 = arith.constant 16 : index
    %c0_6 = arith.constant 0 : index
    %11 = vector.load %arg3[%c16, %c0_6] : memref<176x32xf32, #tpu.memory_space<vmem>>, vector<32x32xf32>
    %c112 = arith.constant 112 : index
    %c0_7 = arith.constant 0 : index
    %12 = vector.load %arg3[%c112, %c0_7] : memref<176x32xf32, #tpu.memory_space<vmem>>, vector<1x32xf32>
    %cst_8 = arith.constant dense<0.000000e+00> : vector<128x32xf32>
    %13 = tpu.matmul %7, %11, %cst_8 {dimension_numbers = #tpu.dot_dimension_numbers<[1], [0], [0], [1], [0, 0, 1, 1], [], []>} : vector<128x32xf32>, vector<32x32xf32>, vector<128x32xf32> -> vector<128x32xf32>
    %14 = vector.broadcast %12 : vector<1x32xf32> to vector<128x32xf32>
    %15 = arith.addf %13, %14 : vector<128x32xf32>
    %cst_9 = arith.constant 0.000000e+00 : f32
    %16 = vector.broadcast %cst_9 : f32 to vector<128x32xf32>
    %17 = arith.maximumf %15, %16 : vector<128x32xf32>
    %c88 = arith.constant 88 : index
    %c0_10 = arith.constant 0 : index
    %18 = vector.load %arg3[%c88, %c0_10] : memref<176x32xf32, #tpu.memory_space<vmem>>, vector<1x32xf32>
    %19 = vector.broadcast %18 : vector<1x32xf32> to vector<128x32xf32>
    %20 = arith.mulf %17, %19 : vector<128x32xf32>
    %21 = arith.addf %10, %20 : vector<128x32xf32>
    %c48 = arith.constant 48 : index
    %c0_11 = arith.constant 0 : index
    %22 = vector.load %arg3[%c48, %c0_11] : memref<176x32xf32, #tpu.memory_space<vmem>>, vector<32x32xf32>
    %c120 = arith.constant 120 : index
    %c0_12 = arith.constant 0 : index
    %23 = vector.load %arg3[%c120, %c0_12] : memref<176x32xf32, #tpu.memory_space<vmem>>, vector<1x32xf32>
    %cst_13 = arith.constant dense<0.000000e+00> : vector<128x32xf32>
    %24 = tpu.matmul %17, %22, %cst_13 {dimension_numbers = #tpu.dot_dimension_numbers<[1], [0], [0], [1], [0, 0, 1, 1], [], []>} : vector<128x32xf32>, vector<32x32xf32>, vector<128x32xf32> -> vector<128x32xf32>
    %25 = vector.broadcast %23 : vector<1x32xf32> to vector<128x32xf32>
    %26 = arith.addf %24, %25 : vector<128x32xf32>
    %cst_14 = arith.constant 0.000000e+00 : f32
    %27 = vector.broadcast %cst_14 : f32 to vector<128x32xf32>
    %28 = arith.maximumf %26, %27 : vector<128x32xf32>
    %c96 = arith.constant 96 : index
    %c0_15 = arith.constant 0 : index
    %29 = vector.load %arg3[%c96, %c0_15] : memref<176x32xf32, #tpu.memory_space<vmem>>, vector<1x32xf32>
    %30 = vector.broadcast %29 : vector<1x32xf32> to vector<128x32xf32>
    %31 = arith.mulf %28, %30 : vector<128x32xf32>
    %32 = arith.addf %21, %31 : vector<128x32xf32>
    %c0_16 = arith.constant 0 : index
    %c0_17 = arith.constant 0 : index
    %33 = vector.load %arg2[%c0_16, %c0_17] : memref<64x16xf32, #tpu.memory_space<vmem>>, vector<64x16xf32>
    %cst_18 = arith.constant 1.000000e+00 : f32
    %34 = vector.broadcast %cst_18 : f32 to vector<1x32xf32>
    %35 = vector.extract_strided_slice %32 {offsets = [0, 0], sizes = [64, 32], strides = [1, 1]} : vector<128x32xf32> to vector<64x32xf32>
    %cst_19 = arith.constant dense<0.000000e+00> : vector<1x64xf32>
    %36 = tpu.matmul %34, %35, %cst_19 {dimension_numbers = #tpu.dot_dimension_numbers<[1], [1], [0], [0], [0, 0, 1, 0], [], []>} : vector<1x32xf32>, vector<64x32xf32>, vector<1x64xf32> -> vector<1x64xf32>
    %cst_20 = arith.constant dense<0.000000e+00> : vector<1x16xf32>
    %37 = tpu.matmul %36, %33, %cst_20 {dimension_numbers = #tpu.dot_dimension_numbers<[1], [0], [0], [1], [0, 0, 1, 1], [], []>} : vector<1x64xf32>, vector<64x16xf32>, vector<1x16xf32> -> vector<1x16xf32>
    %38 = vector.extract_strided_slice %32 {offsets = [64, 0], sizes = [64, 32], strides = [1, 1]} : vector<128x32xf32> to vector<64x32xf32>
    %cst_21 = arith.constant dense<0.000000e+00> : vector<1x64xf32>
    %39 = tpu.matmul %34, %38, %cst_21 {dimension_numbers = #tpu.dot_dimension_numbers<[1], [1], [0], [0], [0, 0, 1, 0], [], []>} : vector<1x32xf32>, vector<64x32xf32>, vector<1x64xf32> -> vector<1x64xf32>
    %cst_22 = arith.constant dense<0.000000e+00> : vector<1x16xf32>
    %40 = tpu.matmul %39, %33, %cst_22 {dimension_numbers = #tpu.dot_dimension_numbers<[1], [0], [0], [1], [0, 0, 1, 1], [], []>} : vector<1x64xf32>, vector<64x16xf32>, vector<1x16xf32> -> vector<1x16xf32>
    %c168 = arith.constant 168 : index
    %c0_23 = arith.constant 0 : index
    %41 = vector.load %arg3[%c168, %c0_23] : memref<176x32xf32, #tpu.memory_space<vmem>>, vector<1x32xf32>
    %42 = vector.extract_strided_slice %41 {offsets = [0, 0], sizes = [1, 1], strides = [1, 1]} : vector<1x32xf32> to vector<1x1xf32>
    %43 = tpu.concatenate %37, %40 in 0 : vector<1x16xf32>, vector<1x16xf32> -> vector<2x16xf32>
    %44 = vector.broadcast %42 : vector<1x1xf32> to vector<2x16xf32>
    %45 = arith.addf %43, %44 : vector<2x16xf32>
    %c128 = arith.constant 128 : index
    %c0_24 = arith.constant 0 : index
    %46 = vector.load %arg3[%c128, %c0_24] : memref<176x32xf32, #tpu.memory_space<vmem>>, vector<16x32xf32>
    %c144 = arith.constant 144 : index
    %c0_25 = arith.constant 0 : index
    %47 = vector.load %arg3[%c144, %c0_25] : memref<176x32xf32, #tpu.memory_space<vmem>>, vector<1x32xf32>
    %cst_26 = arith.constant dense<0.000000e+00> : vector<2x32xf32>
    %48 = tpu.matmul %45, %46, %cst_26 {dimension_numbers = #tpu.dot_dimension_numbers<[1], [0], [0], [1], [0, 0, 1, 1], [], []>} : vector<2x16xf32>, vector<16x32xf32>, vector<2x32xf32> -> vector<2x32xf32>
    %49 = vector.broadcast %47 : vector<1x32xf32> to vector<2x32xf32>
    %50 = arith.addf %48, %49 : vector<2x32xf32>
    %cst_27 = arith.constant 0.000000e+00 : f32
    %51 = vector.broadcast %cst_27 : f32 to vector<2x32xf32>
    %52 = arith.maximumf %50, %51 : vector<2x32xf32>
    %c152 = arith.constant 152 : index
    %c0_28 = arith.constant 0 : index
    %53 = vector.load %arg3[%c152, %c0_28] : memref<176x32xf32, #tpu.memory_space<vmem>>, vector<8x32xf32>
    %c160 = arith.constant 160 : index
    %c0_29 = arith.constant 0 : index
    %54 = vector.load %arg3[%c160, %c0_29] : memref<176x32xf32, #tpu.memory_space<vmem>>, vector<1x32xf32>
    %55 = vector.extract_strided_slice %54 {offsets = [0, 0], sizes = [1, 8], strides = [1, 1]} : vector<1x32xf32> to vector<1x8xf32>
    %cst_30 = arith.constant dense<0.000000e+00> : vector<2x8xf32>
    %56 = tpu.matmul %52, %53, %cst_30 {dimension_numbers = #tpu.dot_dimension_numbers<[1], [1], [0], [0], [0, 0, 1, 0], [], []>} : vector<2x32xf32>, vector<8x32xf32>, vector<2x8xf32> -> vector<2x8xf32>
    %57 = vector.broadcast %55 : vector<1x8xf32> to vector<2x8xf32>
    %58 = arith.addf %56, %57 : vector<2x8xf32>
    %cst_31 = arith.constant dense<0xFF800000> : vector<2xf32>
    %59 = vector.multi_reduction <maximumf>, %58, %cst_31 [1] : vector<2x8xf32> to vector<2xf32>
    %60 = vector.shape_cast %59 : vector<2xf32> to vector<2x1xf32>
    %61 = vector.broadcast %60 : vector<2x1xf32> to vector<2x8xf32>
    %62 = arith.subf %58, %61 : vector<2x8xf32>
    %63 = math.exp %62 : vector<2x8xf32>
    %cst_32 = arith.constant dense<0.000000e+00> : vector<2xf32>
    %64 = vector.multi_reduction <add>, %63, %cst_32 [1] : vector<2x8xf32> to vector<2xf32>
    %65 = vector.shape_cast %64 : vector<2xf32> to vector<2x1xf32>
    %66 = math.log %65 : vector<2x1xf32>
    %67 = arith.addf %66, %60 : vector<2x1xf32>
    %68 = vector.broadcast %67 : vector<2x1xf32> to vector<2x8xf32>
    %69 = arith.subf %58, %68 : vector<2x8xf32>
    %c0_33 = arith.constant 0 : index
    %c0_34 = arith.constant 0 : index
    %70 = vector.load %arg4[%c0_33, %c0_34] : memref<2x8xf32, #tpu.memory_space<vmem>>, vector<2x8xf32>
    tpu.vector_store %arg4[%c0_33, %c0_34], %69 {strides = array<i32>} : memref<2x8xf32, #tpu.memory_space<vmem>>, vector<2x8xf32>,
    return
  }
  func.func @transform_0(%arg0: i32) -> (i32, i32) {
    %c0_i32 = arith.constant 0 : i32
    %c0_i32_0 = arith.constant 0 : i32
    %c0_i32_1 = arith.constant 0 : i32
    return %c0_i32, %c0_i32_0 : i32, i32
  }
  func.func @transform_1(%arg0: i32) -> (i32, i32) {
    %c0_i32 = arith.constant 0 : i32
    %c0_i32_0 = arith.constant 0 : i32
    %c0_i32_1 = arith.constant 0 : i32
    return %c0_i32, %c0_i32_0 : i32, i32
  }
  func.func @transform_2(%arg0: i32) -> (i32, i32) {
    %c0_i32 = arith.constant 0 : i32
    %c0_i32_0 = arith.constant 0 : i32
    %c0_i32_1 = arith.constant 0 : i32
    return %c0_i32, %c0_i32_0 : i32, i32
  }
  func.func @transform_3(%arg0: i32) -> (i32, i32) {
    %c0_i32 = arith.constant 0 : i32
    %c0_i32_0 = arith.constant 0 : i32
    %c0_i32_1 = arith.constant 0 : i32
    return %c0_i32, %c0_i32_0 : i32, i32
  }
}

</mosaic_0001>

<bundles_post_ra>
// kernel: mlp_model_forward.1
= control target key start
LH: loop header
LB: loop body
LE: loop exit
PB: predicated region body
PF: predicated region fallthrough
CT: control target
= control target key end

     0   :  { %vm38_vm0 = vcmask 130048   ;;  %s2334_s0 = inlined_call_operand.vmem [shape: f32[128,16], index: 0, kind: input, shape index: {}]   ;;  %s2335_s1 = inlined_call_operand.vmem [shape: f32[64,16], index: 1, kind: input, shape index: {}]   ;;  %s2336_s2 = inlined_call_operand.vmem [shape: f32[176,32], index: 2, kind: input, shape index: {}]   ;;  %s2337_s3 = inlined_call_operand.hbm [shape: f32[2,8], index: 3, kind: output, shape index: {}]  }
   0x1   :  { %v31_v0 = vld [vmem:[%s2336_s2] sm:$0xff]  ;;  %v32_v1 = vld [vmem:[%s2336_s2 + $0x8] sm:$0xff]  ;;  %v17_v5 = vld [vmem:[%s2334_s0 + $0x10] sm:$0xff] }
   0x2   :  { %v15_v2 = vld [vmem:[%s2334_s0] sm:$0xff]  ;;  %v1687_v3 = vpack.c.bf16 %v32_v1, %v31_v0  ;;  %v16_v4 = vld [vmem:[%s2334_s0 + $0x8] sm:$0xff]  ;;  %v269_v6 = vld [vmem:[%s2336_s2 + $0x10] sm:$0xff] }
   0x3   :  { %1511 = vmatprep.mubr.msk.f32.mxu0 %vm38_vm0, %v15_v2  ;;  %v270_v7 = vld [vmem:[%s2336_s2 + $0x18] sm:$0xff] }
   0x4   :  { %1688 = vmatprep.subr.bf16.mxu0 %v1687_v3 }
   0x5   :  { %1690 = vmatpush3.bf16.msra.mxu0 %v1687_v3 }
   0x6   :  { %8 = vsyncpa [#allocation3], 0  ;;  %v1691_v8 = vpack.c.bf16 %v270_v7, %v269_v6  ;;  %v18_v9 = vld [vmem:[%s2334_s0 + $0x18] sm:$0xff]  ;;  %v19_v10 = vld [vmem:[%s2334_s0 + $0x20] sm:$0xff]  ;;  %vm278_vm1 = vcmask 261120   ;;  %vm1802_vm2 = vmmov 0  }
   0x7   :  { %v20_v11 = vld [vmem:[%s2334_s0 + $0x28] sm:$0xff]  ;;  %v21_v12 = vld [vmem:[%s2334_s0 + $0x30] sm:$0xff]  ;;  %v22_v13 = vld [vmem:[%s2334_s0 + $0x38] sm:$0xff]  ;;  %vm885_vm4 = vcmask 523264   ;;  %vm1130_vm5 = vcmask 1040384   ;;  %vm1300_vm6 = vcmask 58368  }
   0x8   :  { %1512 = vmatmul.mubr.msk.f32.vlgmr.msra.gmra.mrb[0].mxu0 %vm38_vm0, %v16_v4  ;;  %1692 = vmatprep.subr.bf16.mxu1 %v1691_v8  ;;  %v23_v14 = vld [vmem:[%s2334_s0 + $0x40] sm:$0xff]  ;;  %v24_v15 = vld [vmem:[%s2334_s0 + $0x48] sm:$0xff]  ;;  %v25_v16 = vld [vmem:[%s2334_s0 + $0x50] sm:$0xff] }
   0x9   :  { %1514 = vmatprep.mubr.msk.f32.mxu0 %vm38_vm0, %v17_v5  ;;  %1694 = vmatpush3.bf16.msra.mxu1 %v1691_v8  ;;  %v26_v17 = vld [vmem:[%s2334_s0 + $0x58] sm:$0xff]  ;;  %v27_v18 = vld [vmem:[%s2334_s0 + $0x60] sm:$0xff]  ;;  %v28_v19 = vld [vmem:[%s2334_s0 + $0x68] sm:$0xff] }
   0xa   :  { %v29_v20 = vld [vmem:[%s2334_s0 + $0x70] sm:$0xff]  ;;  %v30_v21 = vld [vmem:[%s2334_s0 + $0x78] sm:$0xff]  ;;  %v271_v22 = vld [vmem:[%s2336_s2 + $0x20] sm:$0xff] }
   0xb   :  { %v272_v23 = vld [vmem:[%s2336_s2 + $0x28] sm:$0xff]  ;;  %v525_v25 = vld [vmem:[%s2336_s2 + $0x30] sm:$0xff]  ;;  %v526_v26 = vld [vmem:[%s2336_s2 + $0x38] sm:$0xff] }
   0xc   :  { %1515 = vmatmul.mubr.msk.f32.gmra.mrb[2].mxu0 %vm38_vm0, %v18_v9  ;;  %v1695_v24 = vpack.c.bf16 %v272_v23, %v271_v22  ;;  %v527_v27 = vld [vmem:[%s2336_s2 + $0x40] sm:$0xff]  ;;  %v1699_v28 = vpack.c.bf16 %v526_v26, %v525_v25  ;;  %v528_v29 = vld [vmem:[%s2336_s2 + $0x48] sm:$0xff]  ;;  %vm2190_vm3 = vmpackc.low %vm278_vm1, %vm278_vm1 }
   0xd   :  { %1517 = vmatprep.mubr.msk.f32.mxu0 %vm38_vm0, %v19_v10  ;;  %v1703_v30 = vpack.c.bf16 %v528_v29, %v527_v27  ;;  %v1329_v31 = vld [vmem:[%s2336_s2 + $0x68] ss:$0 sm:$0xff] }
   0xe   :  { %1696 = vmatprep.subr.bf16.mxu1 %v1695_v24  ;;  %1700 = vmatprep.subr.bf16.mxu0 %v1699_v28 }
   0xf   :  { %1698 = vmatpush3.bf16.msra.mxu1 %v1695_v24  ;;  %1702 = vmatpush3.bf16.msra.mxu0 %v1699_v28 }
  0x10   :  { %1518 = vmatmul.mubr.msk.f32.gmra.mrb[4].mxu0 %vm38_vm0, %v20_v11  ;;  %1704 = vmatprep.subr.bf16.mxu0 %v1703_v30 }
  0x11   :  { %1520 = vmatprep.mubr.msk.f32.mxu0 %vm38_vm0, %v21_v12 }
  0x13   :  { %1706 = vmatpush3.bf16.msra.mxu0 %v1703_v30 }
  0x14   :  { %1521 = vmatmul.mubr.msk.f32.gmra.mrb[6].mxu0 %vm38_vm0, %v22_v13 }
  0x15   :  { %1523 = vmatprep.mubr.msk.f32.mxu0 %vm38_vm0, %v23_v14 }
  0x18   :  { %1524 = vmatmul.mubr.msk.f32.gmra.mrb[8].mxu0 %vm38_vm0, %v24_v15 }
  0x19   :  { %1526 = vmatprep.mubr.msk.f32.mxu0 %vm38_vm0, %v25_v16  ;;  %v2022_v16 = vld [vmem:[%s2336_s2 + $0x70] ss:$0 sm:$0xff] }
  0x1c   :  { %1527 = vmatmul.mubr.msk.f32.gmra.mrb[10].mxu0 %vm38_vm0, %v26_v17 }
  0x1d   :  { %1529 = vmatprep.mubr.msk.f32.mxu0 %vm38_vm0, %v27_v18 }
  0x20   :  { %1530 = vmatmul.mubr.msk.f32.gmra.mrb[12].mxu0 %vm38_vm0, %v28_v19 }
  0x21   :  { %1532 = vmatprep.mubr.msk.f32.mxu0 %vm38_vm0, %v29_v20  ;;  %v2028_v20 = vld [vmem:[%s2336_s2 + $0x50] ss:$0 sm:$0xff] }
  0x24   :  { %1533 = vmatmul.mubr.msk.f32.gmra.mrb[14].mxu0 %vm38_vm0, %v30_v21  ;;  %v2033_v21 = vld [vmem:[%s2336_s2 + $0x58] ss:$0 sm:$0xff] }
  0xdb   :  { %v1513_v32 = vpop.f32.mrb[0].mxu0 }
  0xdc   :  { %v1923_v33 = vadd.f32 %v1513_v32, %v1329_v31  ;;  %v153_v34 = vpop.f32.mrb[1].mxu0 }
  0xdd   :  { %v1925_v35 = vadd.f32 %v1329_v31, %v153_v34 }
  0xde   :  { %v233_v38 = vmax.f32 %v1923_v33, 0.0 }
  0xdf   :  { %v232_v36 = vmax.f32 %v1925_v35, 0.0  ;;  %v1516_v37 = vpop.f32.mrb[2].mxu0 }
  0xe0   :  { %v1929_v39 = vadd.f32 %v1516_v37, %v1329_v31  ;;  %v163_v40 = vpop.f32.mrb[3].mxu0  ;;  %v254_v26 = vmul.f32 %v2028_v20, %v233_v38 }
  0xe1   :  { %v1931_v41 = vadd.f32 %v1329_v31, %v163_v40  ;;  %1543 = vmatprep.mubr.msk.f32.mxu1 %vm278_vm1, %v232_v36  ;;  %v253_v30 = vmul.f32 %v2028_v20, %v232_v36 }
  0xe2   :  { %1544 = vmatmul.mubr.msk.f32.vlgmr.msra.gmra.mrb[0].mxu1 %vm278_vm1, %v233_v38  ;;  %v235_v44 = vmax.f32 %v1929_v39, 0.0 }
  0xe3   :  { %v234_v42 = vmax.f32 %v1931_v41, 0.0  ;;  %v1519_v43 = vpop.f32.mrb[4].mxu0 }
  0xe4   :  { %v1941_v45 = vadd.f32 %v1519_v43, %v1329_v31  ;;  %v173_v46 = vpop.f32.mrb[5].mxu0  ;;  %v256_v35 = vmul.f32 %v2028_v20, %v235_v44 }
  0xe5   :  { %v1943_v47 = vadd.f32 %v1329_v31, %v173_v46  ;;  %1546 = vmatprep.mubr.msk.f32.mxu1 %vm278_vm1, %v234_v42 }
  0xe6   :  { %1547 = vmatmul.mubr.msk.f32.gmra.mrb[2].mxu1 %vm278_vm1, %v235_v44  ;;  %v237_v50 = vmax.f32 %v1941_v45, 0.0 }
  0xe7   :  { %v236_v48 = vmax.f32 %v1943_v47, 0.0  ;;  %v1522_v49 = vpop.f32.mrb[6].mxu0 }
  0xe8   :  { %v1953_v51 = vadd.f32 %v1522_v49, %v1329_v31  ;;  %v183_v52 = vpop.f32.mrb[7].mxu0  ;;  %v255_v49 = vmul.f32 %v2028_v20, %v234_v42  ;;  %v258_v41 = vmul.f32 %v2028_v20, %v237_v50 }
  0xe9   :  { %v1955_v53 = vadd.f32 %v1329_v31, %v183_v52  ;;  %1549 = vmatprep.mubr.msk.f32.mxu1 %vm278_vm1, %v236_v48 }
  0xea   :  { %1550 = vmatmul.mubr.msk.f32.gmra.mrb[4].mxu1 %vm278_vm1, %v237_v50  ;;  %v239_v56 = vmax.f32 %v1953_v51, 0.0 }
  0xeb   :  { %v238_v54 = vmax.f32 %v1955_v53, 0.0  ;;  %v1525_v55 = vpop.f32.mrb[8].mxu0 }
  0xec   :  { %v1965_v57 = vadd.f32 %v1525_v55, %v1329_v31  ;;  %v193_v58 = vpop.f32.mrb[9].mxu0  ;;  %v260_v47 = vmul.f32 %v2028_v20, %v239_v56 }
  0xed   :  { %v1967_v59 = vadd.f32 %v1329_v31, %v193_v58  ;;  %1552 = vmatprep.mubr.msk.f32.mxu1 %vm278_vm1, %v238_v54 }
  0xee   :  { %1553 = vmatmul.mubr.msk.f32.gmra.mrb[6].mxu1 %vm278_vm1, %v239_v56  ;;  %v241_v62 = vmax.f32 %v1965_v57, 0.0 }
  0xef   :  { %v240_v60 = vmax.f32 %v1967_v59, 0.0  ;;  %v1528_v61 = vpop.f32.mrb[10].mxu0 }
  0xf0   :  { %v1977_v63 = vadd.f32 %v1528_v61, %v1329_v31  ;;  %v203_v0 = vpop.f32.mrb[11].mxu0  ;;  %v262_v53 = vmul.f32 %v2028_v20, %v241_v62 }
  0xf1   :  { %v1979_v1 = vadd.f32 %v1329_v31, %v203_v0  ;;  %1555 = vmatprep.mubr.msk.f32.mxu1 %vm278_vm1, %v240_v60 }
  0xf2   :  { %v243_v2 = vmax.f32 %v1977_v63, 0.0  ;;  %1556 = vmatmul.mubr.msk.f32.gmra.mrb[8].mxu1 %vm278_vm1, %v241_v62 }
  0xf3   :  { %v242_v3 = vmax.f32 %v1979_v1, 0.0  ;;  %v1531_v4 = vpop.f32.mrb[12].mxu0 }
  0xf4   :  { %v1989_v5 = vadd.f32 %v1531_v4, %v1329_v31  ;;  %v213_v6 = vpop.f32.mrb[13].mxu0  ;;  %v264_v59 = vmul.f32 %v2028_v20, %v243_v2 }
  0xf5   :  { %v1991_v7 = vadd.f32 %v1329_v31, %v213_v6  ;;  %1558 = vmatprep.mubr.msk.f32.mxu1 %vm278_vm1, %v242_v3 }
  0xf6   :  { %v245_v8 = vmax.f32 %v1989_v5, 0.0  ;;  %1559 = vmatmul.mubr.msk.f32.gmra.mrb[10].mxu1 %vm278_vm1, %v243_v2 }
  0xf7   :  { %v244_v9 = vmax.f32 %v1991_v7, 0.0  ;;  %v1534_v10 = vpop.f32.mrb[14].mxu0 }
  0xf8   :  { %v2001_v11 = vadd.f32 %v1534_v10, %v1329_v31  ;;  %v223_v12 = vpop.f32.mrb[15].mxu0  ;;  %v257_v10 = vmul.f32 %v2028_v20, %v236_v48  ;;  %v266_v1 = vmul.f32 %v2028_v20, %v245_v8 }
  0xf9   :  { %v2003_v13 = vadd.f32 %v1329_v31, %v223_v12  ;;  %1561 = vmatprep.mubr.msk.f32.mxu1 %vm278_vm1, %v244_v9 }
  0xfa   :  { %v247_v14 = vmax.f32 %v2001_v11, 0.0  ;;  %1562 = vmatmul.mubr.msk.f32.gmra.mrb[12].mxu1 %vm278_vm1, %v245_v8  ;;  %v1803_v11 = vmov 0.0  }
  0xfb   :  { %v246_v15 = vmax.f32 %v2003_v13, 0.0  ;;  %v2171_v13 = vld [vmem:[%s2336_s2 + $0x78] ss:$0 sm:$0xff] }
  0xfc   :  { %v268_v7 = vmul.f32 %v2028_v20, %v247_v14 }
  0xfd   :  { %1564 = vmatprep.mubr.msk.f32.mxu1 %vm278_vm1, %v246_v15 }
  0xfe   :  { %1565 = vmatmul.mubr.msk.f32.gmra.mrb[14].mxu1 %vm278_vm1, %v247_v14 }
  0xff   :  { %1615 = vmatprep.mubr.msk.f32.mxu1 %vm1802_vm2, %v1803_v11 }
 0x1b5   :  { %v1545_v17 = vpop.f32.mrb[0].mxu1 }
 0x1b6   :  { %v399_v18 = vadd.f32 %v1545_v17, %v2022_v16  ;;  %v393_v19 = vpop.f32.mrb[1].mxu1 }
 0x1b7   :  { %v394_v22 = vadd.f32 %v2022_v16, %v393_v19 }
 0x1b8   :  { %v473_v23 = vmax.f32 %v399_v18, 0.0 }
 0x1b9   :  { %v472_v24 = vmax.f32 %v394_v22, 0.0  ;;  %v1548_v25 = vpop.f32.mrb[2].mxu1 }
 0x1ba   :  { %v494_v27 = vmul.f32 %v2033_v21, %v473_v23  ;;  %v409_v28 = vadd.f32 %v1548_v25, %v2022_v16  ;;  %v403_v29 = vpop.f32.mrb[3].mxu1  ;;  %v259_v25 = vmul.f32 %v2028_v20, %v238_v54 }
 0x1bb   :  { %v493_v31 = vmul.f32 %v2033_v21, %v472_v24  ;;  %v404_v32 = vadd.f32 %v2022_v16, %v403_v29  ;;  %1575 = vmatprep.mubr.msk.f32.mxu0 %vm278_vm1, %v472_v24 }
 0x1bc   :  { %v2047_v34 = vadd.f32 %v494_v27, %v254_v26  ;;  %v475_v33 = vmax.f32 %v409_v28, 0.0  ;;  %1576 = vmatmul.mubr.msk.f32.vlgmr.msra.gmra.mrb[16].mxu0 %vm278_vm1, %v473_v23 }
 0x1bd   :  { %v2050_v37 = vadd.f32 %v493_v31, %v253_v30  ;;  %v474_v38 = vmax.f32 %v404_v32, 0.0  ;;  %v1551_v40 = vpop.f32.mrb[4].mxu1 }
 0x1be   :  { %v496_v36 = vmul.f32 %v2033_v21, %v475_v33  ;;  %v419_v43 = vadd.f32 %v1551_v40, %v2022_v16  ;;  %v413_v46 = vpop.f32.mrb[5].mxu1 }
 0x1bf   :  { %v495_v52 = vmul.f32 %v2033_v21, %v474_v38  ;;  %v414_v55 = vadd.f32 %v2022_v16, %v413_v46  ;;  %1578 = vmatprep.mubr.msk.f32.mxu0 %vm278_vm1, %v474_v38 }
 0x1c0   :  { %v2063_v58 = vadd.f32 %v496_v36, %v256_v35  ;;  %v477_v39 = vmax.f32 %v419_v43, 0.0  ;;  %1579 = vmatmul.mubr.msk.f32.gmra.mrb[18].mxu0 %vm278_vm1, %v475_v33  ;;  %v261_v33 = vmul.f32 %v2028_v20, %v240_v60 }
 0x1c1   :  { %v2066_v44 = vadd.f32 %v495_v52, %v255_v49  ;;  %v476_v61 = vmax.f32 %v414_v55, 0.0  ;;  %v1554_v0 = vpop.f32.mrb[6].mxu1  ;;  %v263_v52 = vmul.f32 %v2028_v20, %v242_v3 }
 0x1c2   :  { %v498_v42 = vmul.f32 %v2033_v21, %v477_v39  ;;  %v429_v4 = vadd.f32 %v1554_v0, %v2022_v16  ;;  %v423_v6 = vpop.f32.mrb[7].mxu1 }
 0x1c3   :  { %v497_v12 = vmul.f32 %v2033_v21, %v476_v61  ;;  %v424_v17 = vadd.f32 %v2022_v16, %v423_v6  ;;  %1581 = vmatprep.mubr.msk.f32.mxu0 %vm278_vm1, %v476_v61  ;;  %v265_v6 = vmul.f32 %v2028_v20, %v244_v9 }
 0x1c4   :  { %v2079_v18 = vadd.f32 %v498_v42, %v258_v41  ;;  %v479_v45 = vmax.f32 %v429_v4, 0.0  ;;  %1582 = vmatmul.mubr.msk.f32.gmra.mrb[20].mxu0 %vm278_vm1, %v477_v39 }
 0x1c5   :  { %v2082_v50 = vadd.f32 %v497_v12, %v257_v10  ;;  %v478_v19 = vmax.f32 %v424_v17, 0.0  ;;  %v1557_v22 = vpop.f32.mrb[8].mxu1 }
 0x1c6   :  { %v500_v48 = vmul.f32 %v2033_v21, %v479_v45  ;;  %v439_v23 = vadd.f32 %v1557_v22, %v2022_v16  ;;  %v433_v24 = vpop.f32.mrb[9].mxu1 }
 0x1c7   :  { %v499_v26 = vmul.f32 %v2033_v21, %v478_v19  ;;  %v434_v27 = vadd.f32 %v2022_v16, %v433_v24  ;;  %1584 = vmatprep.mubr.msk.f32.mxu0 %vm278_vm1, %v478_v19 }
 0x1c8   :  { %v2095_v28 = vadd.f32 %v500_v48, %v260_v47  ;;  %v481_v51 = vmax.f32 %v439_v23, 0.0  ;;  %1585 = vmatmul.mubr.msk.f32.gmra.mrb[22].mxu0 %vm278_vm1, %v479_v45  ;;  %v1801_v48 = vmov 0.0|0.0  }
 0x1c9   :  { %v2098_v56 = vadd.f32 %v499_v26, %v259_v25  ;;  %v480_v29 = vmax.f32 %v434_v27, 0.0  ;;  %v1560_v30 = vpop.f32.mrb[10].mxu1  ;;  %1707 = vmatprep.subr.bf16.mxu1 %v1801_v48  ;;  %1735 = vmatprep.subr.bf16.mxu0 %v1801_v48 }
 0x1ca   :  { %v502_v54 = vmul.f32 %v2033_v21, %v481_v51  ;;  %v449_v31 = vadd.f32 %v1560_v30, %v2022_v16  ;;  %v443_v32 = vpop.f32.mrb[11].mxu1 }
 0x1cb   :  { %v501_v38 = vmul.f32 %v2033_v21, %v480_v29  ;;  %v444_v40 = vadd.f32 %v2022_v16, %v443_v32  ;;  %1587 = vmatprep.mubr.msk.f32.mxu0 %vm278_vm1, %v480_v29 }
 0x1cc   :  { %v2111_v35 = vadd.f32 %v502_v54, %v262_v53  ;;  %v483_v57 = vmax.f32 %v449_v31, 0.0  ;;  %1588 = vmatmul.mubr.msk.f32.gmra.mrb[24].mxu0 %vm278_vm1, %v481_v51 }
 0x1cd   :  { %v2114_v62 = vadd.f32 %v501_v38, %v261_v33  ;;  %v482_v36 = vmax.f32 %v444_v40, 0.0  ;;  %v1563_v43 = vpop.f32.mrb[12].mxu1 }
 0x1ce   :  { %v504_v60 = vmul.f32 %v2033_v21, %v483_v57  ;;  %v459_v46 = vadd.f32 %v1563_v43, %v2022_v16  ;;  %v453_v49 = vpop.f32.mrb[13].mxu1 }
 0x1cf   :  { %v503_v55 = vmul.f32 %v2033_v21, %v482_v36  ;;  %v454_v39 = vadd.f32 %v2022_v16, %v453_v49  ;;  %1590 = vmatprep.mubr.msk.f32.mxu0 %vm278_vm1, %v482_v36 }
 0x1d0   :  { %v2127_v61 = vadd.f32 %v504_v60, %v264_v59  ;;  %v485_v63 = vmax.f32 %v459_v46, 0.0  ;;  %1591 = vmatmul.mubr.msk.f32.gmra.mrb[26].mxu0 %vm278_vm1, %v483_v57 }
 0x1d1   :  { %v2130_v2 = vadd.f32 %v503_v55, %v263_v52  ;;  %v484_v0 = vmax.f32 %v454_v39, 0.0  ;;  %v1566_v41 = vpop.f32.mrb[14].mxu1 }
 0x1d2   :  { %v506_v3 = vmul.f32 %v2033_v21, %v485_v63  ;;  %v469_v42 = vadd.f32 %v1566_v41, %v2022_v16  ;;  %v463_v4 = vpop.f32.mrb[15].mxu1 }
 0x1d3   :  { %v505_v10 = vmul.f32 %v2033_v21, %v484_v0  ;;  %v464_v12 = vadd.f32 %v2022_v16, %v463_v4  ;;  %1593 = vmatprep.mubr.msk.f32.mxu0 %vm278_vm1, %v484_v0  ;;  %v267_v16 = vmul.f32 %v2028_v20, %v246_v15 }
 0x1d4   :  { %v2143_v17 = vadd.f32 %v506_v3, %v266_v1  ;;  %v487_v5 = vmax.f32 %v469_v42, 0.0  ;;  %1594 = vmatmul.mubr.msk.f32.gmra.mrb[28].mxu0 %vm278_vm1, %v485_v63 }
 0x1d5   :  { %v2146_v8 = vadd.f32 %v505_v10, %v265_v6  ;;  %v486_v45 = vmax.f32 %v464_v12, 0.0 }
 0x1d6   :  { %v508_v9 = vmul.f32 %v2033_v21, %v487_v5 }
 0x1d7   :  { %v507_v19 = vmul.f32 %v2033_v21, %v486_v45  ;;  %1596 = vmatprep.mubr.msk.f32.mxu0 %vm278_vm1, %v486_v45  ;;  %v2177_v21 = vld [vmem:[%s2336_s2 + $0x60] ss:$0 sm:$0xff] }
 0x1d8   :  { %v2157_v22 = vadd.f32 %v508_v9, %v268_v7  ;;  %1597 = vmatmul.mubr.msk.f32.gmra.mrb[30].mxu0 %vm278_vm1, %v487_v5 }
 0x1d9   :  { %v2160_v47 = vadd.f32 %v507_v19, %v267_v16  ;;  %1653 = vmatprep.mubr.msk.f32.mxu0 %vm1802_vm2, %v1803_v11 }
 0x28f   :  { %v1577_v14 = vpop.f32.mrb[16].mxu0 }
 0x290   :  { %v654_v15 = vadd.f32 %v1577_v14, %v2171_v13  ;;  %v648_v20 = vpop.f32.mrb[17].mxu0 }
 0x291   :  { %v649_v23 = vadd.f32 %v2171_v13, %v648_v20 }
 0x292   :  { %v728_v24 = vmax.f32 %v654_v15, 0.0 }
 0x293   :  { %v727_v25 = vmax.f32 %v649_v23, 0.0  ;;  %v1580_v26 = vpop.f32.mrb[18].mxu0 }
 0x294   :  { %v749_v27 = vmul.f32 %v2177_v21, %v728_v24  ;;  %v664_v51 = vadd.f32 %v1580_v26, %v2171_v13  ;;  %v658_v29 = vpop.f32.mrb[19].mxu0 }
 0x295   :  { %v748_v30 = vmul.f32 %v2177_v21, %v727_v25  ;;  %v659_v53 = vadd.f32 %v2171_v13, %v658_v29 }
 0x296   :  { %v765_v54 = vadd.f32 %v749_v27, %v2047_v34  ;;  %v730_v31 = vmax.f32 %v664_v51, 0.0 }
 0x297   :  { %v764_v32 = vadd.f32 %v748_v30, %v2050_v37  ;;  %v729_v33 = vmax.f32 %v659_v53, 0.0  ;;  %v1583_v38 = vpop.f32.mrb[20].mxu0 }
 0x298   :  { %v751_v40 = vmul.f32 %v2177_v21, %v730_v31  ;;  %v674_v57 = vadd.f32 %v1583_v38, %v2171_v13  ;;  %v668_v36 = vpop.f32.mrb[21].mxu0 }
 0x299   :  { %v1708_v59 = vpack.c.bf16 %v765_v54, %v764_v32  ;;  %v750_v60 = vmul.f32 %v2177_v21, %v729_v33  ;;  %v669_v34 = vadd.f32 %v2171_v13, %v668_v36 }
 0x29a   :  { %v767_v37 = vadd.f32 %v751_v40, %v2063_v58  ;;  %v732_v46 = vmax.f32 %v674_v57, 0.0 }
 0x29b   :  { %v766_v49 = vadd.f32 %v750_v60, %v2066_v44  ;;  %v731_v52 = vmax.f32 %v669_v34, 0.0  ;;  %v1586_v55 = vpop.f32.mrb[22].mxu0  ;;  %1710 = vmatpush3.bf16.xpose.msk.msra.mxu1 %vm2190_vm3, %v1708_v59 }
 0x29c   :  { %v753_v39 = vmul.f32 %v2177_v21, %v732_v46  ;;  %v684_v63 = vadd.f32 %v1586_v55, %v2171_v13  ;;  %v678_v0 = vpop.f32.mrb[23].mxu0  ;;  %1711 = vmatprep.subr.bf16.mxu1 %v1801_v48 }
 0x29d   :  { %v1712_v41 = vpack.c.bf16 %v767_v37, %v766_v49  ;;  %v752_v1 = vmul.f32 %v2177_v21, %v731_v52  ;;  %v679_v58 = vadd.f32 %v2171_v13, %v678_v0 }
 0x29e   :  { %v769_v3 = vadd.f32 %v753_v39, %v2079_v18  ;;  %v734_v44 = vmax.f32 %v684_v63, 0.0 }
 0x29f   :  { %v768_v42 = vadd.f32 %v752_v1, %v2082_v50  ;;  %v733_v4 = vmax.f32 %v679_v58, 0.0  ;;  %v1589_v6 = vpop.f32.mrb[24].mxu0  ;;  %v1804_v1 = vmov 1.0  }
 0x2a0   :  { %v755_v10 = vmul.f32 %v2177_v21, %v734_v44  ;;  %v694_v12 = vadd.f32 %v1589_v6, %v2171_v13  ;;  %v688_v5 = vpop.f32.mrb[25].mxu0  ;;  %v785_v44 = vld [vmem:[%s2335_s1 + $0x28] sm:$0xff]  ;;  %v787_v6 = vld [vmem:[%s2335_s1 + $0x38] sm:$0xff] }
 0x2a1   :  { %v1716_v45 = vpack.c.bf16 %v769_v3, %v768_v42  ;;  %v754_v7 = vmul.f32 %v2177_v21, %v733_v4  ;;  %v689_v9 = vadd.f32 %v2171_v13, %v688_v5  ;;  %v784_v3 = vld [vmem:[%s2335_s1 + $0x20] sm:$0xff]  ;;  %v786_v4 = vld [vmem:[%s2335_s1 + $0x30] sm:$0xff] }
 0x2a2   :  { %v771_v16 = vadd.f32 %v755_v10, %v2095_v28  ;;  %v736_v19 = vmax.f32 %v694_v12, 0.0  ;;  %v1730_v42 = vpack.c.bf16 %v785_v44, %v784_v3  ;;  %v1733_v10 = vpack.c.bf16 %v787_v6, %v786_v4  ;;  %v1126_v12 = vld [vmem:[%s2336_s2 + $0xa8] sm:$0x1] }
 0x2a3   :  { %v770_v18 = vadd.f32 %v754_v7, %v2098_v56  ;;  %v735_v14 = vmax.f32 %v689_v9, 0.0  ;;  %v1592_v15 = vpop.f32.mrb[26].mxu0  ;;  %1714 = vmatpush3.bf16.xpose.msk.msra.mxu1 %vm2190_vm3, %v1712_v41  ;;  %1766 = vpush %v1126_v12  ;;  %v1137_v9 = vld [vmem:[%s2336_s2 + $0x80] sm:$0xff] }
 0x2a4   :  { %v757_v50 = vmul.f32 %v2177_v21, %v736_v19  ;;  %v704_v20 = vadd.f32 %v1592_v15, %v2171_v13  ;;  %v698_v23 = vpop.f32.mrb[27].mxu0  ;;  %1715 = vmatprep.subr.bf16.mxu1 %v1801_v48 }
 0x2a5   :  { %v1720_v24 = vpack.c.bf16 %v771_v16, %v770_v18  ;;  %v756_v25 = vmul.f32 %v2177_v21, %v735_v14  ;;  %v699_v28 = vadd.f32 %v2171_v13, %v698_v23  ;;  %v1138_v16 = vld [vmem:[%s2336_s2 + $0x88] sm:$0xff] }
 0x2a6   :  { %v773_v26 = vadd.f32 %v757_v50, %v2111_v35  ;;  %v738_v56 = vmax.f32 %v704_v20, 0.0  ;;  %v1764_v19 = vpack.c.bf16 %v1138_v16, %v1137_v9 }
 0x2a7   :  { %v772_v27 = vadd.f32 %v756_v25, %v2114_v62  ;;  %v737_v51 = vmax.f32 %v699_v28, 0.0  ;;  %v1595_v29 = vpop.f32.mrb[28].mxu0  ;;  %v1218_v25 = vld [vmem:[%s2336_s2 + $0x98] sm:$0xff]  ;;  %v1403_v28 = vld [vmem:[%s2336_s2 + $0x90] ss:$0 sm:$0xff] }
 0x2a8   :  { %v759_v30 = vmul.f32 %v2177_v21, %v738_v56  ;;  %v714_v53 = vadd.f32 %v1595_v29, %v2171_v13  ;;  %v708_v54 = vpop.f32.mrb[29].mxu0 }
 0x2a9   :  { %v1736_v31 = vpack.c.bf16 %v773_v26, %v772_v27  ;;  %v758_v32 = vmul.f32 %v2177_v21, %v737_v51  ;;  %v709_v33 = vadd.f32 %v2171_v13, %v708_v54 }
 0x2aa   :  { %v775_v38 = vadd.f32 %v759_v30, %v2127_v61  ;;  %v740_v40 = vmax.f32 %v714_v53, 0.0 }
 0x2ab   :  { %v774_v35 = vadd.f32 %v758_v32, %v2130_v2  ;;  %v739_v57 = vmax.f32 %v709_v33, 0.0  ;;  %v1598_v36 = vpop.f32.mrb[30].mxu0  ;;  %1718 = vmatpush3.bf16.xpose.msk.msra.mxu1 %vm2190_vm3, %v1716_v45  ;;  %1738 = vmatpush3.bf16.xpose.msk.msra.mxu0 %vm2190_vm3, %v1736_v31 }
 0x2ac   :  { %v761_v62 = vmul.f32 %v2177_v21, %v740_v40  ;;  %v724_v59 = vadd.f32 %v1598_v36, %v2171_v13  ;;  %v718_v60 = vpop.f32.mrb[31].mxu0  ;;  %1719 = vmatprep.subr.bf16.mxu1 %v1801_v48  ;;  %1739 = vmatprep.subr.bf16.mxu0 %v1801_v48 }
 0x2ad   :  { %v1740_v61 = vpack.c.bf16 %v775_v38, %v774_v35  ;;  %v760_v2 = vmul.f32 %v2177_v21, %v739_v57  ;;  %v719_v34 = vadd.f32 %v2171_v13, %v718_v60  ;;  %v782_v13 = vld [vmem:[%s2335_s1 + $0x10] sm:$0xff] }
 0x2ae   :  { %v777_v37 = vadd.f32 %v761_v62, %v2143_v17  ;;  %v742_v46 = vmax.f32 %v724_v59, 0.0  ;;  %v780_v17 = vld [vmem:[%s2335_s1] sm:$0xff] }
 0x2af   :  { %v776_v49 = vadd.f32 %v760_v2, %v2146_v8  ;;  %v741_v52 = vmax.f32 %v719_v34, 0.0  ;;  %v781_v8 = vld [vmem:[%s2335_s1 + $0x8] sm:$0xff] }
 0x2b0   :  { %v763_v55 = vmul.f32 %v2177_v21, %v742_v46 }
 0x2b1   :  { %v1744_v39 = vpack.c.bf16 %v777_v37, %v776_v49  ;;  %v762_v63 = vmul.f32 %v2177_v21, %v741_v52  ;;  %v783_v21 = vld [vmem:[%s2335_s1 + $0x18] sm:$0xff] }
 0x2b2   :  { %v779_v0 = vadd.f32 %v763_v55, %v2157_v22  ;;  %v1727_v58 = vpack.c.bf16 %v783_v21, %v782_v13 }
 0x2b3   :  { %v778_v41 = vadd.f32 %v762_v63, %v2160_v47  ;;  %1722 = vmatpush3.bf16.xpose.msk.msra.mxu1 %vm2190_vm3, %v1720_v24  ;;  %1742 = vmatpush3.bf16.xpose.msk.msra.mxu0 %vm2190_vm3, %v1740_v61  ;;  %v1724_v47 = vpack.c.bf16 %v781_v8, %v780_v17 }
 0x2b4   :  { %1743 = vmatprep.subr.bf16.mxu0 %v1801_v48  ;;  %1723 = vmatprep.subr.bf16.mxu1 %v1801_v48 }
 0x2b5   :  { %v1748_v22 = vpack.c.bf16 %v779_v0, %v778_v41 }
 0x2ba   :  { %1616 = vmatmul.mubr.msk.f32.vlgmr.msra.gmra.mrb[16].mxu1 %vm278_vm1, %v1804_v1 }
 0x2bb   :  { %1746 = vmatpush3.bf16.xpose.msk.msra.mxu0 %vm2190_vm3, %v1744_v39  ;;  %1725 = vmatpush3.bf16.msra.mxu1 %v1724_v47 }
 0x2bc   :  { %1747 = vmatprep.subr.bf16.mxu0 %v1801_v48  ;;  %1726 = vmatprep.subr.bf16.mxu1 %v1801_v48 }
 0x2bd   :  { %1634 = vmatprep.mubr.msk.f32.mxu1 %vm1802_vm2, %v1803_v11 }
 0x2bf   :  { %1728 = vmatpush3.bf16.msra.mxu1 %v1727_v58 }
 0x2c0   :  { %1729 = vmatprep.subr.bf16.mxu1 %v1801_v48 }
 0x2c3   :  { %1750 = vmatpush3.bf16.xpose.msk.msra.mxu0 %vm2190_vm3, %v1748_v22  ;;  %1731 = vmatpush3.bf16.msra.mxu1 %v1730_v42 }
 0x2c4   :  { %1732 = vmatprep.subr.bf16.mxu1 %v1801_v48  ;;  %1763 = vmatprep.subr.bf16.mxu0 %v1801_v48 }
 0x2c7   :  { %1734 = vmatpush3.bf16.msra.mxu1 %v1733_v10 }
 0x2c8   :  { %1751 = vmatprep.subr.bf16.mxu1 %v1801_v48 }
 0x2ca   :  { %1654 = vmatmul.mubr.msk.f32.vlgmr.msra.gmra.mrb[32].mxu0 %vm278_vm1, %v1804_v1 }
 0x2cb   :  { %1679 = vmatprep.mubr.msk.f32.mxu0 %vm1802_vm2, %v1803_v11  ;;  %1765 = vmatpush3.bf16.msra.mxu0 %v1764_v19 }
 0x2cc   :  { %1682 = vmatprep.subr.mxu0 %v1803_v11 }
 0x2d4   :  { %s1767_s14 = spop %1766 }
 0x2d5   :  { %v1134_v20 = vstv %s1767_s14 }
 0x38d   :  { %v881_v43 = vpop.f32.mrb[16].mxu1 }
 0x38e   :  { %v1617_v5 = vpop.f32.mrb[17].mxu1  ;;  %1635 = vmatmul.mubr.msk.f32.vlgmr.msra.gmra.mrb[18].mxu1 %vm885_vm4, %v881_v43 }
 0x38f   :  { %1753 = vmatpush3.bf16.msra.mxu1 %v1724_v47  ;;  %1672 = vmatprep.mubr.msk.f32.mxu1 %vm1802_vm2, %v1803_v11 }
 0x390   :  { %1754 = vmatprep.subr.bf16.mxu1 %v1801_v48 }
 0x393   :  { %1756 = vmatpush3.bf16.msra.mxu1 %v1727_v58 }
 0x394   :  { %1757 = vmatprep.subr.bf16.mxu1 %v1801_v48 }
 0x397   :  { %1759 = vmatpush3.bf16.msra.mxu1 %v1730_v42 }
 0x398   :  { %1760 = vmatprep.subr.bf16.mxu1 %v1801_v48 }
 0x39b   :  { %1762 = vmatpush3.bf16.msra.mxu1 %v1733_v10 }
 0x39d   :  { %v1049_v45 = vpop.f32.mrb[32].mxu0 }
 0x39e   :  { %v1655_v7 = vpop.f32.mrb[33].mxu0  ;;  %1673 = vmatmul.mubr.msk.f32.vlgmr.msra.gmra.mrb[20].mxu1 %vm885_vm4, %v1049_v45 }
 0x461   :  { %v955_v18 = vpop.f32.mrb[18].mxu1 }
 0x462   :  { %v1636_v14 = vpop.f32.mrb[19].mxu1 }
 0x471   :  { %v1122_v48 = vpop.f32.mrb[20].mxu1 }
 0x472   :  { %v1128_v15 = vrot.slane %v1122_v48, 7  ;;  %v1674_v50 = vpop.f32.mrb[21].mxu1 }
 0x474   :  { %v1131_v23 = vsel %vm1130_vm5, %v955_v18, %v1128_v15 }
 0x475   :  { %v1136_v24 = vadd.f32 %v1134_v20, %v1131_v23 }
 0x477   :  { %1680 = vmatmul.mubr.msk.f32.vlgmr.msra.gmra.mrb[34].mxu0 %vm38_vm0, %v1136_v24 }
 0x478   :  { %1684 = vmatprep.mubr.msk.f32.mxu0 %vm1802_vm2, %v1803_v11  ;;  %1683 = vmatpush3.xpose.msk.msra.mxu0 %vm278_vm1, %v1218_v25  ;;  %v1405_v11 = vld [vmem:[%s2336_s2 + $0xa0] ss:$0 sm:$0xff]  ;;  %s1805_s2 = smov [#allocation2]  }
 0x479   :  { %s1321_s21 = sshll.u32 %s1805_s2, 4  ;;  %s1322_s21 = int_to_ptr.vmem [resolvable:$true] %s1321_s21 }
 0x47a   :  { %s1777_s22 = scalar_lea.vmem %s1322_s21, 32  ;;  %p1782_p1 = scmp.lt.s32.totalorder %s1322_s21, %s1322_s21 }
 0x47b   :  { %p1778_p0 = scmp.ne.s32.totalorder %s1322_s21, %s1777_s22  ;;  %p1783_p2 = scmp.lt.s32.totalorder %s1777_s22, %s1777_s22 }
 0x47d   :  { %p1784_p3 = por %p1783_p2, %p1782_p1 }
 0x47f   :  { %p1785_p4 = pnand %p1784_p3, %p1778_p0 }
 0x54a   :  { %v1213_v26 = vpop.f32.mrb[34].mxu0 }
 0x54b   :  { %v1214_v56 = vadd.f32 %v1403_v28, %v1213_v26  ;;  %v1681_v27 = vpop.f32.mrb[35].mxu0 }
 0x54d   :  { %v1217_v51 = vmax.f32 %v1214_v56, 0.0 }
 0x54f   :  { %1685 = vmatmul.mubr.msk.f32.vlgmr.msra.gmra.mrb[36].mxu0 %vm278_vm1, %v1217_v51 }
 0x622   :  { %v1296_v29 = vpop.f32.mrb[36].mxu0 }
 0x623   :  { %v1297_v30 = vadd.f32 %v1405_v11, %v1296_v29  ;;  %v1686_v53 = vpop.f32.mrb[37].mxu0 }
 0x625   :  { %v1301_v54 = vsel %vm1300_vm6, %v1297_v30, -inf }
 0x626   :  { %1302 = vmax.xlane.f32.xlu0 %v1301_v54 }
 0x6b3   :  { %v1303_v31 = vpop.xlane.xlu0 %1302 }
 0x6b4   :  { %v1304_v32 = vsub.f32 %v1297_v30, %v1303_v31 }
 0x6b6   :  { %v1305_v33 = vmul.f32 1.442695, %v1304_v32 }
 0x6b8   :  { %1773 = vpow2.f32 %v1305_v33 }
 0x6c2   :  { %v1774_v38 = vpop.eup %1773 }
 0x6c3   :  { %v1307_v40 = vsel %vm1300_vm6, %v1774_v38, 0.0 }
 0x6c4   :  { %1308 = vadd.xlane.f32.xlu0 %v1307_v40 }
 0x751   :  { %v1309_v35 = vpop.xlane.xlu0 %1308 }
 0x752   :  { %1775 = vlog2.f32 %v1309_v35 }
 0x75c   :  { %v1776_v57 = vpop.eup %1775 }
 0x75d   :  { %v1311_v36 = vmul.f32 0.6931472, %v1776_v57 }
 0x75f   :  { %v1312_v62 = vadd.f32 %v1311_v36, %v1303_v31 }
 0x761   :  { %v1313_v59 = vsub.f32 %v1297_v30, %v1312_v62 }
 0x763   :  { %1314 = vst.msk [vmem:[#allocation2] sm:$0x3] %vm1300_vm6, %v1313_v59 }
 0x764   :  { %1788 = shalt.err (!%p1785_p4)
}
 0x765   :  { %s1789_s25 = scalar_lea.hbm %s2337_s3, 32 }
 0x766   :  { %p1790_p5 = scmp.ne.s32.totalorder %s2337_s3, %s1789_s25  ;;  %p1793_p6 = scmp.lt.u32.totalorder %s1789_s25, %s2337_s3 }
 0x768   :  { %p1795_p7 = pnand %p1793_p6, %p1790_p5 }
 0x76a   :  { %1798 = shalt.err (!%p1795_p7)
}
 0x76b   :  { %1324 = dma.vmem_to_hbm [thread:$0]  %s1322_s21, 32, %s2337_s3, [#allocation3]  }
 0x76c   :  { %1799 = dma.done.wait [#allocation3], 32  }
 0x76d   :  { %1800 = vsyncadd [#allocation3], 4294967264 }
 0x76e   :  { %1328 = vsyncpa [#allocation3], 1 }

</bundles_post_ra>
